<compile_context>
chip_gen: v7x
topology: tpu7x:2x2x1
jax: 0.10.0
libtpu: 0.0.40
codegen_flags: <defaults>
</compile_context>

<pallas_src>
import math

import jax
import jax.numpy as jnp
import numpy as np
from jax.experimental import pallas as pl
from jax.experimental.pallas import tpu as pltpu

_LANES = 128
_SUBLANES = 8
_MAX_BLOCK_ROWS = 1024  # 1024 x 128 x 4 B = 512 KiB per block buffer


def _i32(v):
    """Python int -> int32 two's-complement constant (wraps >= 2**31)."""
    v &= 0xFFFFFFFF
    return jnp.int32(v - (1 << 32) if v >= (1 << 31) else v)


def _lsr(x, k):
    """Logical right shift for int32: arithmetic shift + mask of high bits."""
    return (x >> k) & jnp.int32((1 << (32 - k)) - 1)


def _mix32(x):
    """'lowbias32' integer hash (Wellons) using wrapping int32 arithmetic."""
    x = x ^ _lsr(x, 16)
    x = x * _i32(0x7FEB352D)
    x = x ^ _lsr(x, 15)
    x = x * _i32(0x846CA68B)
    x = x ^ _lsr(x, 16)
    return x


def _erfinv_f32(x):
    """float32 erfinv (Giles 2010) -- only log/sqrt transcendentals."""
    w = -jnp.log((1.0 - x) * (1.0 + x))
    ws = w - 2.5
    wb = jnp.sqrt(w) - 3.0

    p_s = jnp.float32(2.81022636e-08)
    for c in (3.43273939e-07, -3.5233877e-06, -4.39150654e-06, 0.00021858087,
              -0.00125372503, -0.00417768164, 0.246640727, 1.50140941):
        p_s = jnp.float32(c) + p_s * ws

    p_b = jnp.float32(-0.000200214257)
    for c in (0.000100950558, 0.00134934322, -0.00367342844, 0.00573950773,
              -0.0076224613, 0.00943887047, 1.00167406, 2.83297682):
        p_b = jnp.float32(c) + p_b * wb

    return jnp.where(w < 5.0, p_s, p_b) * x


def _add_gaussian_noise_kernel(seed_ref, params_ref, x_ref, o_ref):
    rows, lanes = x_ref.shape
    tile = pl.program_id(0)

    # Unique per-element counter (global flat index) -> same noise regardless
    # of tiling or which TensorCore processes the tile.
    row_ids = jax.lax.broadcasted_iota(jnp.int32, (rows, lanes), 0)
    col_ids = jax.lax.broadcasted_iota(jnp.int32, (rows, lanes), 1)
    idx = (tile * rows + row_ids) * lanes + col_ids

    # Counter-based stateless PRNG (pure int32 VPU ops).
    state = idx + seed_ref[0] * _i32(0x9E3779B9)
    bits = _mix32(_mix32(state) ^ _i32(0x85EBCA6B))

    # 23 random bits -> uniform in (-1, 1), strictly excluding the endpoints
    # (exact f32 arithmetic, so log() below never sees 0).
    b23 = _lsr(bits, 9).astype(jnp.float32)
    u = (b23 + 0.5) * jnp.float32(2.0 ** -22) - 1.0

    # z ~ N(0, 1) via inverse CDF: Phi^{-1}(p) = sqrt(2) * erfinv(2p - 1).
    z = jnp.float32(math.sqrt(2.0)) * _erfinv_f32(u)

    mean = params_ref[0]
    std = params_ref[1]
    noise = z * std + mean
    o_ref[...] = (x_ref[...].astype(jnp.float32) + noise).astype(o_ref.dtype)


def add_gaussian_noise(x, seed, mean=0.0, std=1.0):
    """JAX/Pallas equivalent of AddGaussianNoise(mean, std)(x)."""
    orig_shape = x.shape
    orig_dtype = x.dtype
    total = int(np.prod(orig_shape))

    # Lane-dense 2D slab (rows, 128); rows rounded up to a multiple of 8 so
    # every block satisfies the (8, 128) tile constraint.  Padding (at most
    # 1023 elements) only happens when total % 1024 != 0.
    rows = -(-total // _LANES)
    rows = ((rows + _SUBLANES - 1) // _SUBLANES) * _SUBLANES
    padded = rows * _LANES

    flat = x.reshape(-1)
    if padded != total:
        flat = jnp.pad(flat, (0, padded - total))
    x2d = flat.reshape(rows, _LANES)

    block_rows = min(rows, _MAX_BLOCK_ROWS)
    grid = pl.cdiv(rows, block_rows)  # ragged last block is fine (elementwise)

    seed_arr = jnp.asarray([seed], dtype=jnp.int32)
    params = jnp.asarray([mean, std], dtype=jnp.float32)

    itemsize = jnp.dtype(orig_dtype).itemsize
    cost = pl.CostEstimate(
        flops=60 * total,
        transcendentals=2 * total,
        bytes_accessed=2 * total * itemsize,
    )

    out2d = pl.pallas_call(
        _add_gaussian_noise_kernel,
        out_shape=jax.ShapeDtypeStruct((rows, _LANES), orig_dtype),
        grid_spec=pltpu.PrefetchScalarGridSpec(
            num_scalar_prefetch=2,
            grid=(grid,),
            in_specs=[pl.BlockSpec((block_rows, _LANES), lambda i, *_: (i, 0))],
            out_specs=pl.BlockSpec((block_rows, _LANES), lambda i, *_: (i, 0)),
        ),
        compiler_params=pltpu.CompilerParams(
            dimension_semantics=("parallel",),
        ),
        cost_estimate=cost,
    )(seed_arr, params, x2d)

    out = out2d.reshape(-1)
    if padded != total:
        out = out[:total]
    return out.reshape(orig_shape)


if __name__ == "__main__":
    key = jax.random.PRNGKey(0)
    # NCHW input, consistent with the dataloader's image tensors.
    x = jax.random.normal(key, (2, 4, 16, 16), dtype=jnp.float32)

    mean, std = 0.0, 1.0
    out = add_gaussian_noise(x, seed=1234, mean=mean, std=std)
    out = jax.block_until_ready(out)

    # Sanity checks: shape/dtype preserved, noise actually added, and its
    # statistics look like N(mean, std^2).
    assert out.shape == x.shape and out.dtype == x.dtype
    noise = np.asarray(out - x)
    assert np.all(np.isfinite(noise))
    assert not np.allclose(noise, 0.0)
    assert abs(noise.mean() - mean) < 0.2
    assert abs(noise.std() - std) < 0.2

    print("KERNEL_OK")
</pallas_src>

<mosaic_0001>
module attributes {stable_mosaic.version = 11 : i64} {
  func.func @_add_gaussian_noise_kernel(%arg0: i32, %arg1: memref<1xi32, #tpu.memory_space<smem>>, %arg2: memref<2xf32, #tpu.memory_space<smem>>, %arg3: memref<16x128xf32, #tpu.memory_space<vmem>>, %arg4: memref<16x128xf32, #tpu.memory_space<vmem>>) attributes {dimension_semantics = [#tpu.dimension_semantics<parallel>], iteration_bounds = array<i64: 1>, scalar_prefetch = 2 : i64, scratch_operands = 0 : i64, tpu.core_type = #tpu.core_type<tc>, window_params = [{transform_indices = @transform_0, window_bounds = array<i64: 16, 128>}, {transform_indices = @transform_1, window_bounds = array<i64: 16, 128>}]} {
    %0 = tpu.iota {dimensions = array<i32: 0>} : vector<16x128xi32>
    %1 = tpu.iota {dimensions = array<i32: 1>} : vector<16x128xi32>
    %c16_i32 = arith.constant 16 : i32
    %2 = arith.muli %arg0, %c16_i32 : i32
    %3 = vector.broadcast %2 : i32 to vector<16x128xi32>
    %4 = arith.addi %3, %0 : vector<16x128xi32>
    %c128_i32 = arith.constant 128 : i32
    %5 = vector.broadcast %c128_i32 : i32 to vector<16x128xi32>
    %6 = arith.muli %4, %5 : vector<16x128xi32>
    %7 = arith.addi %6, %1 : vector<16x128xi32>
    %c0 = arith.constant 0 : index
    %8 = memref.load %arg1[%c0] : memref<1xi32, #tpu.memory_space<smem>>
    %c-1640531527_i32 = arith.constant -1640531527 : i32
    %9 = arith.muli %8, %c-1640531527_i32 : i32
    %10 = vector.broadcast %9 : i32 to vector<16x128xi32>
    %11 = arith.addi %7, %10 : vector<16x128xi32>
    %c16_i32_0 = arith.constant 16 : i32
    %12 = vector.broadcast %c16_i32_0 : i32 to vector<16x128xi32>
    %13 = arith.shrsi %11, %12 : vector<16x128xi32>
    %c65535_i32 = arith.constant 65535 : i32
    %14 = vector.broadcast %c65535_i32 : i32 to vector<16x128xi32>
    %15 = arith.andi %13, %14 : vector<16x128xi32>
    %16 = arith.xori %11, %15 : vector<16x128xi32>
    %c2146121005_i32 = arith.constant 2146121005 : i32
    %17 = vector.broadcast %c2146121005_i32 : i32 to vector<16x128xi32>
    %18 = arith.muli %16, %17 : vector<16x128xi32>
    %c15_i32 = arith.constant 15 : i32
    %19 = vector.broadcast %c15_i32 : i32 to vector<16x128xi32>
    %20 = arith.shrsi %18, %19 : vector<16x128xi32>
    %c131071_i32 = arith.constant 131071 : i32
    %21 = vector.broadcast %c131071_i32 : i32 to vector<16x128xi32>
    %22 = arith.andi %20, %21 : vector<16x128xi32>
    %23 = arith.xori %18, %22 : vector<16x128xi32>
    %c-2073254261_i32 = arith.constant -2073254261 : i32
    %24 = vector.broadcast %c-2073254261_i32 : i32 to vector<16x128xi32>
    %25 = arith.muli %23, %24 : vector<16x128xi32>
    %c16_i32_1 = arith.constant 16 : i32
    %26 = vector.broadcast %c16_i32_1 : i32 to vector<16x128xi32>
    %27 = arith.shrsi %25, %26 : vector<16x128xi32>
    %c65535_i32_2 = arith.constant 65535 : i32
    %28 = vector.broadcast %c65535_i32_2 : i32 to vector<16x128xi32>
    %29 = arith.andi %27, %28 : vector<16x128xi32>
    %30 = arith.xori %25, %29 : vector<16x128xi32>
    %c-2048144789_i32 = arith.constant -2048144789 : i32
    %31 = vector.broadcast %c-2048144789_i32 : i32 to vector<16x128xi32>
    %32 = arith.xori %30, %31 : vector<16x128xi32>
    %c16_i32_3 = arith.constant 16 : i32
    %33 = vector.broadcast %c16_i32_3 : i32 to vector<16x128xi32>
    %34 = arith.shrsi %32, %33 : vector<16x128xi32>
    %c65535_i32_4 = arith.constant 65535 : i32
    %35 = vector.broadcast %c65535_i32_4 : i32 to vector<16x128xi32>
    %36 = arith.andi %34, %35 : vector<16x128xi32>
    %37 = arith.xori %32, %36 : vector<16x128xi32>
    %c2146121005_i32_5 = arith.constant 2146121005 : i32
    %38 = vector.broadcast %c2146121005_i32_5 : i32 to vector<16x128xi32>
    %39 = arith.muli %37, %38 : vector<16x128xi32>
    %c15_i32_6 = arith.constant 15 : i32
    %40 = vector.broadcast %c15_i32_6 : i32 to vector<16x128xi32>
    %41 = arith.shrsi %39, %40 : vector<16x128xi32>
    %c131071_i32_7 = arith.constant 131071 : i32
    %42 = vector.broadcast %c131071_i32_7 : i32 to vector<16x128xi32>
    %43 = arith.andi %41, %42 : vector<16x128xi32>
    %44 = arith.xori %39, %43 : vector<16x128xi32>
    %c-2073254261_i32_8 = arith.constant -2073254261 : i32
    %45 = vector.broadcast %c-2073254261_i32_8 : i32 to vector<16x128xi32>
    %46 = arith.muli %44, %45 : vector<16x128xi32>
    %c16_i32_9 = arith.constant 16 : i32
    %47 = vector.broadcast %c16_i32_9 : i32 to vector<16x128xi32>
    %48 = arith.shrsi %46, %47 : vector<16x128xi32>
    %c65535_i32_10 = arith.constant 65535 : i32
    %49 = vector.broadcast %c65535_i32_10 : i32 to vector<16x128xi32>
    %50 = arith.andi %48, %49 : vector<16x128xi32>
    %51 = arith.xori %46, %50 : vector<16x128xi32>
    %c9_i32 = arith.constant 9 : i32
    %52 = vector.broadcast %c9_i32 : i32 to vector<16x128xi32>
    %53 = arith.shrsi %51, %52 : vector<16x128xi32>
    %c8388607_i32 = arith.constant 8388607 : i32
    %54 = vector.broadcast %c8388607_i32 : i32 to vector<16x128xi32>
    %55 = arith.andi %53, %54 : vector<16x128xi32>
    %56 = arith.sitofp %55 : vector<16x128xi32> to vector<16x128xf32>
    %cst = arith.constant 5.000000e-01 : f32
    %57 = vector.broadcast %cst : f32 to vector<16x128xf32>
    %58 = arith.addf %56, %57 : vector<16x128xf32>
    %cst_11 = arith.constant 2.38418579E-7 : f32
    %59 = vector.broadcast %cst_11 : f32 to vector<16x128xf32>
    %60 = arith.mulf %58, %59 : vector<16x128xf32>
    %cst_12 = arith.constant 1.000000e+00 : f32
    %61 = vector.broadcast %cst_12 : f32 to vector<16x128xf32>
    %62 = arith.subf %60, %61 : vector<16x128xf32>
    %cst_13 = arith.constant 1.000000e+00 : f32
    %63 = vector.broadcast %cst_13 : f32 to vector<16x128xf32>
    %64 = arith.subf %63, %62 : vector<16x128xf32>
    %cst_14 = arith.constant 1.000000e+00 : f32
    %65 = vector.broadcast %cst_14 : f32 to vector<16x128xf32>
    %66 = arith.addf %65, %62 : vector<16x128xf32>
    %67 = arith.mulf %64, %66 : vector<16x128xf32>
    %68 = math.log %67 : vector<16x128xf32>
    %cst_15 = arith.constant 0.000000e+00 : f32
    %69 = vector.broadcast %cst_15 : f32 to vector<16x128xf32>
    %70 = arith.subf %69, %68 : vector<16x128xf32>
    %cst_16 = arith.constant 2.500000e+00 : f32
    %71 = vector.broadcast %cst_16 : f32 to vector<16x128xf32>
    %72 = arith.subf %70, %71 : vector<16x128xf32>
    %73 = math.sqrt %70 : vector<16x128xf32>
    %cst_17 = arith.constant 3.000000e+00 : f32
    %74 = vector.broadcast %cst_17 : f32 to vector<16x128xf32>
    %75 = arith.subf %73, %74 : vector<16x128xf32>
    %cst_18 = arith.constant 2.81022636E-8 : f32
    %76 = vector.broadcast %cst_18 : f32 to vector<16x128xf32>
    %77 = arith.mulf %76, %72 : vector<16x128xf32>
    %cst_19 = arith.constant 3.43273939E-7 : f32
    %78 = vector.broadcast %cst_19 : f32 to vector<16x128xf32>
    %79 = arith.addf %78, %77 : vector<16x128xf32>
    %80 = arith.mulf %79, %72 : vector<16x128xf32>
    %cst_20 = arith.constant -3.5233877E-6 : f32
    %81 = vector.broadcast %cst_20 : f32 to vector<16x128xf32>
    %82 = arith.addf %81, %80 : vector<16x128xf32>
    %83 = arith.mulf %82, %72 : vector<16x128xf32>
    %cst_21 = arith.constant -4.39150654E-6 : f32
    %84 = vector.broadcast %cst_21 : f32 to vector<16x128xf32>
    %85 = arith.addf %84, %83 : vector<16x128xf32>
    %86 = arith.mulf %85, %72 : vector<16x128xf32>
    %cst_22 = arith.constant 2.1858087E-4 : f32
    %87 = vector.broadcast %cst_22 : f32 to vector<16x128xf32>
    %88 = arith.addf %87, %86 : vector<16x128xf32>
    %89 = arith.mulf %88, %72 : vector<16x128xf32>
    %cst_23 = arith.constant -0.00125372503 : f32
    %90 = vector.broadcast %cst_23 : f32 to vector<16x128xf32>
    %91 = arith.addf %90, %89 : vector<16x128xf32>
    %92 = arith.mulf %91, %72 : vector<16x128xf32>
    %cst_24 = arith.constant -0.00417768164 : f32
    %93 = vector.broadcast %cst_24 : f32 to vector<16x128xf32>
    %94 = arith.addf %93, %92 : vector<16x128xf32>
    %95 = arith.mulf %94, %72 : vector<16x128xf32>
    %cst_25 = arith.constant 0.246640727 : f32
    %96 = vector.broadcast %cst_25 : f32 to vector<16x128xf32>
    %97 = arith.addf %96, %95 : vector<16x128xf32>
    %98 = arith.mulf %97, %72 : vector<16x128xf32>
    %cst_26 = arith.constant 1.50140941 : f32
    %99 = vector.broadcast %cst_26 : f32 to vector<16x128xf32>
    %100 = arith.addf %99, %98 : vector<16x128xf32>
    %cst_27 = arith.constant -2.00214257E-4 : f32
    %101 = vector.broadcast %cst_27 : f32 to vector<16x128xf32>
    %102 = arith.mulf %101, %75 : vector<16x128xf32>
    %cst_28 = arith.constant 1.00950558E-4 : f32
    %103 = vector.broadcast %cst_28 : f32 to vector<16x128xf32>
    %104 = arith.addf %103, %102 : vector<16x128xf32>
    %105 = arith.mulf %104, %75 : vector<16x128xf32>
    %cst_29 = arith.constant 0.00134934322 : f32
    %106 = vector.broadcast %cst_29 : f32 to vector<16x128xf32>
    %107 = arith.addf %106, %105 : vector<16x128xf32>
    %108 = arith.mulf %107, %75 : vector<16x128xf32>
    %cst_30 = arith.constant -0.00367342844 : f32
    %109 = vector.broadcast %cst_30 : f32 to vector<16x128xf32>
    %110 = arith.addf %109, %108 : vector<16x128xf32>
    %111 = arith.mulf %110, %75 : vector<16x128xf32>
    %cst_31 = arith.constant 0.00573950773 : f32
    %112 = vector.broadcast %cst_31 : f32 to vector<16x128xf32>
    %113 = arith.addf %112, %111 : vector<16x128xf32>
    %114 = arith.mulf %113, %75 : vector<16x128xf32>
    %cst_32 = arith.constant -0.0076224613 : f32
    %115 = vector.broadcast %cst_32 : f32 to vector<16x128xf32>
    %116 = arith.addf %115, %114 : vector<16x128xf32>
    %117 = arith.mulf %116, %75 : vector<16x128xf32>
    %cst_33 = arith.constant 0.00943887047 : f32
    %118 = vector.broadcast %cst_33 : f32 to vector<16x128xf32>
    %119 = arith.addf %118, %117 : vector<16x128xf32>
    %120 = arith.mulf %119, %75 : vector<16x128xf32>
    %cst_34 = arith.constant 1.00167406 : f32
    %121 = vector.broadcast %cst_34 : f32 to vector<16x128xf32>
    %122 = arith.addf %121, %120 : vector<16x128xf32>
    %123 = arith.mulf %122, %75 : vector<16x128xf32>
    %cst_35 = arith.constant 2.83297682 : f32
    %124 = vector.broadcast %cst_35 : f32 to vector<16x128xf32>
    %125 = arith.addf %124, %123 : vector<16x128xf32>
    %cst_36 = arith.constant 5.000000e+00 : f32
    %126 = vector.broadcast %cst_36 : f32 to vector<16x128xf32>
    %127 = arith.cmpf olt, %70, %126 : vector<16x128xf32>
    %128 = arith.select %127, %100, %125 : vector<16x128xi1>, vector<16x128xf32>
    %129 = arith.mulf %128, %62 : vector<16x128xf32>
    %cst_37 = arith.constant 1.41421354 : f32
    %130 = vector.broadcast %cst_37 : f32 to vector<16x128xf32>
    %131 = arith.mulf %130, %129 : vector<16x128xf32>
    %c0_38 = arith.constant 0 : index
    %132 = memref.load %arg2[%c0_38] : memref<2xf32, #tpu.memory_space<smem>>
    %c1 = arith.constant 1 : index
    %133 = memref.load %arg2[%c1] : memref<2xf32, #tpu.memory_space<smem>>
    %134 = vector.broadcast %133 : f32 to vector<16x128xf32>
    %135 = arith.mulf %131, %134 : vector<16x128xf32>
    %136 = vector.broadcast %132 : f32 to vector<16x128xf32>
    %137 = arith.addf %135, %136 : vector<16x128xf32>
    %c0_39 = arith.constant 0 : index
    %c0_40 = arith.constant 0 : index
    %138 = vector.load %arg3[%c0_39, %c0_40] : memref<16x128xf32, #tpu.memory_space<vmem>>, vector<16x128xf32>
    %139 = arith.addf %138, %137 : vector<16x128xf32>
    %c0_41 = arith.constant 0 : index
    %c0_42 = arith.constant 0 : index
    %140 = vector.load %arg4[%c0_41, %c0_42] : memref<16x128xf32, #tpu.memory_space<vmem>>, vector<16x128xf32>
    tpu.vector_store %arg4[%c0_41, %c0_42], %139 {strides = array<i32>} : memref<16x128xf32, #tpu.memory_space<vmem>>, vector<16x128xf32>,
    return
  }
  func.func @transform_0(%arg0: i32, %arg1: memref<1xi32, #tpu.memory_space<smem>>, %arg2: memref<2xf32, #tpu.memory_space<smem>>) -> (i32, i32) {
    %c0_i32 = arith.constant 0 : i32
    %c0_i32_0 = arith.constant 0 : i32
    return %arg0, %c0_i32 : i32, i32
  }
  func.func @transform_1(%arg0: i32, %arg1: memref<1xi32, #tpu.memory_space<smem>>, %arg2: memref<2xf32, #tpu.memory_space<smem>>) -> (i32, i32) {
    %c0_i32 = arith.constant 0 : i32
    %c0_i32_0 = arith.constant 0 : i32
    return %arg0, %c0_i32 : i32, i32
  }
}

</mosaic_0001>

<bundles_post_ra>
// kernel: tpu_custom_call.1
= control target key start
LH: loop header
LB: loop body
LE: loop exit
PB: predicated region body
PF: predicated region fallthrough
CT: control target
= control target key end

     0   :  { %s448_s0 = inlined_call_operand.<no memory space> [shape: s32[1], index: 0, kind: input, shape index: {}]   ;;  %s449_s1 = inlined_call_operand.vmem [shape: f32[2], index: 1, kind: input, shape index: {}]   ;;  %s450_s2 = inlined_call_operand.hbm [shape: f32[16,128], index: 2, kind: input, shape index: {}]   ;;  %s451_s3 = inlined_call_operand.hbm [shape: f32[16,128], index: 3, kind: output, shape index: {}]  }
   0x1   :  { %s9_s14 = sshll.u32 %s449_s1, 4  ;;  %s10_s14 = int_to_ptr.vmem [resolvable:$true] %s9_s14 }
   0x2   :  { %s275_s15 = scalar_lea.vmem %s10_s14, 16  ;;  %p280_p1 = scmp.lt.s32.totalorder %s10_s14, %s10_s14 }
   0x3   :  { %p276_p0 = scmp.ne.s32.totalorder %s10_s14, %s275_s15  ;;  %p281_p2 = scmp.lt.s32.totalorder %s275_s15, %s275_s15 }
   0x5   :  { %p282_p3 = por %p281_p2, %p280_p1 }
   0x7   :  { %p283_p4 = pnand %p282_p3, %p276_p0 }
   0x9   :  { %286 = shalt.err (!%p283_p4)  }
   0xa   :  { %s337_s16 = smov [#allocation4]  }
   0xb   :  { %12 = dma.vmem_to_smem %s10_s14, 16, %s337_s16, [#allocation2] }
   0xc   :  { %331 = dma.done.wait [#allocation2], 16 }
   0xd   :  { %332 = vsyncadd [#allocation2], 4294967280 }
   0xe   :  { %14 = sfence }
   0xf   :  { %15 = vsyncpa [#allocation6], 0 }
  0x10   :  { %16 = vsyncpa [#allocation7], 0  ;;  %s338_s17 = smov [#allocation5]   ;;  %s287_s20 = scalar_lea.hbm %s450_s2, 256 }
  0x11   :  { %s22_s18 = sshll.u32 %s338_s17, 4  ;;  %p288_p5 = scmp.ne.s32.totalorder %s450_s2, %s287_s20  ;;  %s23_s18 = int_to_ptr.vmem [resolvable:$true] %s22_s18 }
  0x12   :  { %p291_p6 = scmp.lt.u32.totalorder %s287_s20, %s450_s2 }
  0x14   :  { %p293_p7 = pnand %p291_p6, %p288_p5 }
  0x16   :  { %296 = shalt.err (!%p293_p7)
}
  0x17   :  { %s297_s25 = scalar_lea.vmem %s23_s18, 256  ;;  %p302_p9 = scmp.lt.s32.totalorder %s23_s18, %s23_s18 }
  0x18   :  { %p298_p8 = scmp.ne.s32.totalorder %s23_s18, %s297_s25  ;;  %p303_p10 = scmp.lt.s32.totalorder %s297_s25, %s297_s25 }
  0x1a   :  { %p304_p11 = por %p303_p10, %p302_p9 }
  0x1c   :  { %p305_p12 = pnand %p304_p11, %p298_p8 }
  0x1e   :  { %308 = shalt.err (!%p305_p12)
}
  0x1f   :  { %s339_s26 = smov 128   ;;  %s340_s27 = smov 8  }
  0x20   :  { %28 = dma.hbm_to_vmem [thread:$0]  %s450_s2, 256, %s23_s18, [#allocation6], %s339_s26, %s339_s26, %s340_s27  }
  0x21   :  { %333 = dma.done.wait [#allocation6], 256  }
  0x22   :  { %334 = vsyncadd [#allocation6], 4294967040  ;;  %v32_v0 = vlaneseq  ;;  %s46_s5 = smul.u32 2654435769, %s448_s0  ;;  %s261_s0 = sld [smem:[#allocation4 + $0x1]] }
  0x23   :  { %s210_s2 = sld [smem:[#allocation4]]  ;;  %s341_s6 = smov [#allocation8]  }
  0x24   :  { %v33_v1 = vshrl.u32 %v32_v0, 7  ;;  %v36_v2 = vand.u32 127, %v32_v0  ;;  %v47_v5 = vstv %s46_s5  ;;  %s229_s7 = sshll.u32 %s341_s6, 4  ;;  %s230_s7 = int_to_ptr.vmem [resolvable:$true] %s229_s7 }
  0x25   :  { %s309_s8 = scalar_lea.vmem %s230_s7, 256  ;;  %p314_p0 = scmp.lt.s32.totalorder %s230_s7, %s230_s7 }
  0x26   :  { %v41_v3 = vmul.u32 128, %v33_v1  ;;  %v34_v4 = vadd.s32 8, %v33_v1  ;;  %p310_p13 = scmp.ne.s32.totalorder %s230_s7, %s309_s8  ;;  %p315_p1 = scmp.lt.s32.totalorder %s309_s8, %s309_s8 }
  0x28   :  { %v43_v6 = vadd.s32 %v41_v3, %v36_v2  ;;  %v42_v7 = vmul.u32 128, %v34_v4  ;;  %p316_p2 = por %p315_p1, %p314_p0 }
  0x2a   :  { %v48_v8 = vadd.s32 %v47_v5, %v43_v6  ;;  %v44_v9 = vadd.s32 %v42_v7, %v36_v2  ;;  %p317_p3 = pnand %p316_p2, %p310_p13 }
  0x2c   :  { %v241_v10 = vshrl.u32 %v48_v8, 16  ;;  %v49_v11 = vadd.s32 %v47_v5, %v44_v9 }
  0x2e   :  { %v54_v12 = vxor.u32 %v241_v10, %v48_v8  ;;  %v242_v13 = vshrl.u32 %v49_v11, 16 }
  0x30   :  { %v56_v14 = vmul.u32 2146121005, %v54_v12  ;;  %v55_v15 = vxor.u32 %v242_v13, %v49_v11 }
  0x32   :  { %v243_v16 = vshrl.u32 %v56_v14, 15  ;;  %v57_v17 = vmul.u32 2146121005, %v55_v15 }
  0x34   :  { %v62_v18 = vxor.u32 %v243_v16, %v56_v14  ;;  %v244_v19 = vshrl.u32 %v57_v17, 15 }
  0x36   :  { %v64_v20 = vmul.u32 2221713035, %v62_v18  ;;  %v63_v21 = vxor.u32 %v244_v19, %v57_v17 }
  0x38   :  { %v245_v22 = vshrl.u32 %v64_v20, 16  ;;  %v65_v23 = vmul.u32 2221713035, %v63_v21 }
  0x3a   :  { %v70_v24 = vxor.u32 %v245_v22, %v64_v20  ;;  %v246_v25 = vshrl.u32 %v65_v23, 16 }
  0x3c   :  { %v72_v26 = vxor.u32 2246822507, %v70_v24  ;;  %v71_v27 = vxor.u32 %v246_v25, %v65_v23 }
  0x3e   :  { %v247_v28 = vshrl.u32 %v72_v26, 16  ;;  %v73_v29 = vxor.u32 2246822507, %v71_v27 }
  0x40   :  { %v78_v30 = vxor.u32 %v247_v28, %v72_v26  ;;  %v248_v31 = vshrl.u32 %v73_v29, 16 }
  0x42   :  { %v80_v32 = vmul.u32 2146121005, %v78_v30  ;;  %v79_v33 = vxor.u32 %v248_v31, %v73_v29 }
  0x44   :  { %v249_v34 = vshrl.u32 %v80_v32, 15  ;;  %v81_v35 = vmul.u32 2146121005, %v79_v33 }
  0x46   :  { %v86_v36 = vxor.u32 %v249_v34, %v80_v32  ;;  %v250_v37 = vshrl.u32 %v81_v35, 15 }
  0x48   :  { %v88_v38 = vmul.u32 2221713035, %v86_v36  ;;  %v87_v39 = vxor.u32 %v250_v37, %v81_v35 }
  0x4a   :  { %v251_v40 = vshrl.u32 %v88_v38, 16  ;;  %v89_v41 = vmul.u32 2221713035, %v87_v39 }
  0x4c   :  { %v94_v42 = vxor.u32 %v251_v40, %v88_v38  ;;  %v252_v43 = vshrl.u32 %v89_v41, 16 }
  0x4e   :  { %v253_v44 = vshrl.u32 %v94_v42, 9  ;;  %v95_v45 = vxor.u32 %v252_v43, %v89_v41 }
  0x50   :  { %v100_v46 = vcvt.s32.f32 %v253_v44  ;;  %v254_v47 = vshrl.u32 %v95_v45, 9 }
  0x52   :  { %v102_v48 = vadd.f32 0.5, %v100_v46  ;;  %v101_v49 = vcvt.s32.f32 %v254_v47 }
  0x54   :  { %v104_v50 = vmul.f32 2.3841858e-07, %v102_v48  ;;  %v103_v51 = vadd.f32 0.5, %v101_v49 }
  0x56   :  { %v383_v52 = vadd.f32 -1.0, %v104_v50  ;;  %v105_v53 = vmul.f32 2.3841858e-07, %v103_v51 }
  0x58   :  { %v108_v54 = vsub.f32 1.0, %v383_v52  ;;  %v110_v55 = vadd.f32 1.0, %v383_v52  ;;  %v387_v56 = vadd.f32 -1.0, %v105_v53 }
  0x5a   :  { %v112_v57 = vmul.f32 %v110_v55, %v108_v54  ;;  %v109_v58 = vsub.f32 1.0, %v387_v56  ;;  %v111_v59 = vadd.f32 1.0, %v387_v56 }
  0x5c   :  { %267 = vlog2.f32 %v112_v57  ;;  %v113_v60 = vmul.f32 %v111_v59, %v109_v58 }
  0x5e   :  { %269 = vlog2.f32 %v113_v60 }
  0x66   :  { %v268_v61 = vpop.eup %267 }
  0x67   :  { %v115_v62 = vmul.f32 0.6931472, %v268_v61 }
  0x68   :  { %v270_v63 = vpop.eup %269 }
  0x69   :  { %v391_v0 = vsub.f32 0.0, %v115_v62  ;;  %v117_v1 = vmul.f32 0.6931472, %v270_v63 }
  0x6b   :  { %v394_v2 = vadd.f32 -2.5, %v391_v0  ;;  %271 = vrsqrt.f32 %v391_v0  ;;  %v397_v3 = vsub.f32 0.0, %v117_v1  ;;  %vm124_vm0 = vcmp.eq.f32.partialorder %v391_v0, inf }
  0x6c   :  { %v127_v13 = vand.u32 2147483648, %v391_v0  ;;  %vm126_vm1 = vcmp.eq.f32.partialorder %v391_v0, 0.0  ;;  %vm202_vm4 = vcmp.lt.f32.partialorder %v391_v0, 5.0 }
  0x6d   :  { %v138_v4 = vmul.f32 2.8102264e-08, %v394_v2  ;;  %v401_v5 = vadd.f32 -2.5, %v397_v3  ;;  %273 = vrsqrt.f32 %v397_v3  ;;  %vm131_vm2 = vcmp.eq.f32.partialorder %v397_v3, inf }
  0x6e   :  { %v134_v20 = vand.u32 2147483648, %v397_v3  ;;  %vm133_vm3 = vcmp.eq.f32.partialorder %v397_v3, 0.0  ;;  %vm203_vm5 = vcmp.lt.f32.partialorder %v397_v3, 5.0 }
  0x6f   :  { %v140_v6 = vadd.f32 3.4327394e-07, %v138_v4  ;;  %v139_v7 = vmul.f32 2.8102264e-08, %v401_v5 }
  0x71   :  { %v142_v8 = vmul.f32 %v394_v2, %v140_v6  ;;  %v141_v9 = vadd.f32 3.4327394e-07, %v139_v7 }
  0x73   :  { %v144_v10 = vadd.f32 -3.5233877e-06, %v142_v8  ;;  %v143_v11 = vmul.f32 %v401_v5, %v141_v9 }
  0x75   :  { %v272_v12 = vpop.eup %271  ;;  %v146_v14 = vmul.f32 %v394_v2, %v144_v10  ;;  %v145_v16 = vadd.f32 -3.5233877e-06, %v143_v11 }
  0x76   :  { %v123_v15 = vmul.f32 %v272_v12, %v391_v0 }
  0x77   :  { %v148_v17 = vadd.f32 -4.3915065e-06, %v146_v14  ;;  %v274_v18 = vpop.eup %273  ;;  %v147_v21 = vmul.f32 %v401_v5, %v145_v16 }
  0x78   :  { %v125_v19 = vsel %vm124_vm0, %v391_v0, %v123_v15  ;;  %v130_v24 = vmul.f32 %v274_v18, %v397_v3 }
  0x79   :  { %v128_v22 = vsel %vm126_vm1, %v127_v13, %v125_v19  ;;  %v150_v23 = vmul.f32 %v394_v2, %v148_v17  ;;  %v149_v26 = vadd.f32 -4.3915065e-06, %v147_v21 }
  0x7a   :  { %v259_v25 = vadd.f32 -3.0, %v128_v22  ;;  %v132_v28 = vsel %vm131_vm2, %v397_v3, %v130_v24  ;;  %v212_v24 = vstv %s261_s0 }
  0x7b   :  { %v152_v27 = vadd.f32 0.00021858087, %v150_v23  ;;  %v135_v30 = vsel %vm133_vm3, %v134_v20, %v132_v28  ;;  %v151_v31 = vmul.f32 %v401_v5, %v149_v26 }
  0x7c   :  { %v170_v29 = vmul.f32 -0.00020021426, %v259_v25  ;;  %v260_v33 = vadd.f32 -3.0, %v135_v30 }
  0x7d   :  { %v154_v32 = vmul.f32 %v394_v2, %v152_v27  ;;  %v153_v35 = vadd.f32 0.00021858087, %v151_v31 }
  0x7e   :  { %v172_v34 = vadd.f32 0.00010095056, %v170_v29  ;;  %v171_v36 = vmul.f32 -0.00020021426, %v260_v33  ;;  %v218_v29 = vld [vmem:[#allocation5] sm:$0xff] }
  0x7f   :  { %v156_v37 = vadd.f32 -0.001253725, %v154_v32  ;;  %v155_v39 = vmul.f32 %v401_v5, %v153_v35 }
  0x80   :  { %v174_v38 = vmul.f32 %v259_v25, %v172_v34  ;;  %v173_v40 = vadd.f32 0.00010095056, %v171_v36  ;;  %v219_v34 = vld [vmem:[#allocation5 + $0x8] sm:$0xff] }
  0x81   :  { %v157_v42 = vadd.f32 -0.001253725, %v155_v39  ;;  %v158_v44 = vmul.f32 %v394_v2, %v156_v37 }
  0x82   :  { %v176_v41 = vadd.f32 0.0013493432, %v174_v38  ;;  %v175_v43 = vmul.f32 %v260_v33, %v173_v40 }
  0x83   :  { %v159_v48 = vmul.f32 %v401_v5, %v157_v42  ;;  %v160_v50 = vadd.f32 -0.0041776816, %v158_v44 }
  0x84   :  { %v178_v45 = vmul.f32 %v259_v25, %v176_v41  ;;  %v177_v46 = vadd.f32 0.0013493432, %v175_v43 }
  0x85   :  { %v161_v55 = vadd.f32 -0.0041776816, %v159_v48  ;;  %v162_v58 = vmul.f32 %v394_v2, %v160_v50 }
  0x86   :  { %v180_v47 = vadd.f32 -0.0036734284, %v178_v45  ;;  %v179_v49 = vmul.f32 %v260_v33, %v177_v46 }
  0x87   :  { %v163_v62 = vmul.f32 %v401_v5, %v161_v55  ;;  %v164_v1 = vadd.f32 0.24664073, %v162_v58 }
  0x88   :  { %v182_v51 = vmul.f32 %v259_v25, %v180_v47  ;;  %v181_v53 = vadd.f32 -0.0036734284, %v179_v49 }
  0x89   :  { %v165_v8 = vadd.f32 0.24664073, %v163_v62  ;;  %v166_v10 = vmul.f32 %v394_v2, %v164_v1 }
  0x8a   :  { %v184_v54 = vadd.f32 0.0057395077, %v182_v51  ;;  %v183_v57 = vmul.f32 %v260_v33, %v181_v53 }
  0x8b   :  { %v167_v14 = vmul.f32 %v401_v5, %v165_v8  ;;  %v168_v16 = vadd.f32 1.5014094, %v166_v10  ;;  %v215_v5 = vstv %s210_s2 }
  0x8c   :  { %v186_v59 = vmul.f32 %v259_v25, %v184_v54  ;;  %v185_v60 = vadd.f32 0.0057395077, %v183_v57 }
  0x8d   :  { %v169_v20 = vadd.f32 1.5014094, %v167_v14 }
  0x8e   :  { %v188_v61 = vadd.f32 -0.0076224613, %v186_v59  ;;  %v187_v63 = vmul.f32 %v260_v33, %v185_v60 }
  0x90   :  { %v190_v4 = vmul.f32 %v259_v25, %v188_v61  ;;  %v189_v6 = vadd.f32 -0.0076224613, %v187_v63 }
  0x92   :  { %v192_v7 = vadd.f32 0.0094388705, %v190_v4  ;;  %v191_v9 = vmul.f32 %v260_v33, %v189_v6 }
  0x94   :  { %v194_v11 = vmul.f32 %v259_v25, %v192_v7  ;;  %v193_v12 = vadd.f32 0.0094388705, %v191_v9 }
  0x96   :  { %v196_v13 = vadd.f32 1.001674, %v194_v11  ;;  %v195_v15 = vmul.f32 %v260_v33, %v193_v12 }
  0x98   :  { %v198_v17 = vmul.f32 %v259_v25, %v196_v13  ;;  %v197_v18 = vadd.f32 1.001674, %v195_v15 }
  0x9a   :  { %v200_v19 = vadd.f32 2.8329768, %v198_v17  ;;  %v199_v21 = vmul.f32 %v260_v33, %v197_v18 }
  0x9c   :  { %v204_v22 = vsel %vm202_vm4, %v168_v16, %v200_v19  ;;  %v201_v23 = vadd.f32 2.8329768, %v199_v21 }
  0x9d   :  { %v206_v2 = vmul.f32 %v383_v52, %v204_v22 }
  0x9e   :  { %v205_v27 = vsel %vm203_vm5, %v169_v20, %v201_v23 }
  0x9f   :  { %v208_v26 = vmul.f32 1.4142135, %v206_v2  ;;  %v207_v28 = vmul.f32 %v387_v56, %v205_v27 }
  0xa1   :  { %v213_v25 = vmul.f32 %v212_v24, %v208_v26  ;;  %v209_v30 = vmul.f32 1.4142135, %v207_v28 }
  0xa3   :  { %v216_v0 = vadd.f32 %v215_v5, %v213_v25  ;;  %v214_v31 = vmul.f32 %v212_v24, %v209_v30 }
  0xa5   :  { %v220_v32 = vadd.f32 %v218_v29, %v216_v0  ;;  %v217_v33 = vadd.f32 %v215_v5, %v214_v31 }
  0xa7   :  { %222 = vst [vmem:[#allocation8] sm:$0xff] %v220_v32  ;;  %v221_v3 = vadd.f32 %v219_v34, %v217_v33 }
  0xa9   :  { %223 = vst [vmem:[#allocation8 + $0x8] sm:$0xff] %v221_v3 }
  0xaa   :  { %320 = shalt.err (!%p317_p3)
}
  0xab   :  { %s321_s11 = scalar_lea.hbm %s451_s3, 256 }
  0xac   :  { %p322_p4 = scmp.ne.s32.totalorder %s451_s3, %s321_s11  ;;  %p325_p5 = scmp.lt.u32.totalorder %s321_s11, %s451_s3 }
  0xae   :  { %p327_p6 = pnand %p325_p5, %p322_p4 }
  0xb0   :  { %330 = shalt.err (!%p327_p6)
}
  0xb1   :  { %235 = dma.vmem_to_hbm [thread:$0]  %s230_s7, 256, %s451_s3, [#allocation7], %s339_s26, %s339_s26, %s340_s27  }
  0xb2   :  { %335 = dma.done.wait [#allocation7], 256  }
  0xb3   :  { %336 = vsyncadd [#allocation7], 4294967040 }
  0xb4   :  { %239 = vsyncpa [#allocation6], 1 }
  0xb5   :  { %240 = vsyncpa [#allocation7], 1 }

</bundles_post_ra>
